<compile_context>
chip_gen: v5e
topology: v5e:2x2
jax: 0.10.0
libtpu: 0.0.40
codegen_flags: <defaults>
</compile_context>

<pallas_src>
import math
import functools

import jax
import jax.numpy as jnp
from jax import lax
from jax.experimental import pallas as pl
from jax.experimental.pallas import tpu as pltpu


_GOLDEN = -1640531527   # 0x9E3779B9 as int32
_MIX2 = -2048144789     # 0x85EBCA6B
_MIX3 = -1028477387     # 0xC2B2AE35


def _fmix32(h):
    """murmur3 finalizer on int32 bit patterns (software-hash fallback)."""
    h = h ^ lax.shift_right_logical(h, jnp.int32(16))
    h = h * jnp.int32(_MIX2)
    h = h ^ lax.shift_right_logical(h, jnp.int32(13))
    h = h * jnp.int32(_MIX3)
    h = h ^ lax.shift_right_logical(h, jnp.int32(16))
    return h


def _keep_threshold_i32(p):
    """Signed-int32 threshold: keep iff bits >= thr, bits uniform over int32.

    P(keep) = 1 - p, with no '& 0x7FFFFFFF' mask needed on the random bits.
    """
    t = int(round(float(p) * 4294967296.0)) - 2147483648
    return max(-(2 ** 31), min(t, 2 ** 31 - 1))


def _to_i32_bits(raw):
    return raw if raw.dtype == jnp.int32 else pltpu.bitcast(raw, jnp.int32)


# -----------------------------------------------------------------------------
# Kernels
# -----------------------------------------------------------------------------
def _pos_enc_kernel_2d(seed_ref, x_ref, pe_ref, o_ref, *,
                       row_stride, ts, dropout_p, apply_dropout, use_hw_prng):
    """Lane-dense path: blocks are (ts, B*D); pe already broadcast over batch."""
    y = x_ref[...] + pe_ref[...]

    if apply_dropout:
        i = pl.program_id(0)
        shape = y.shape  # (ts, B*D), static
        if use_hw_prng:
            pltpu.prng_seed(seed_ref[0] ^ (i * jnp.int32(_GOLDEN) + jnp.int32(1)))
            bits = _to_i32_bits(pltpu.prng_random_bits(shape))
        else:
            # Tiling-invariant hash of the global element index (slimmed:
            # scalar tile base + 2 iotas, seed mix hoisted to a scalar).
            base = (i * ts) * row_stride                      # scalar int32
            seed_mix = seed_ref[0] * jnp.int32(_GOLDEN)       # scalar int32
            r = lax.broadcasted_iota(jnp.int32, shape, 0)
            c = lax.broadcasted_iota(jnp.int32, shape, 1)
            lin = (base + r * jnp.int32(row_stride)) + c
            bits = _fmix32(lin ^ seed_mix)

        thr = jnp.int32(_keep_threshold_i32(dropout_p))
        inv_keep = jnp.asarray(1.0 / (1.0 - dropout_p), dtype=y.dtype)
        y = jnp.where(bits >= thr, y * inv_keep, jnp.zeros((), y.dtype))

    o_ref[...] = y.astype(o_ref.dtype)


def _pos_enc_kernel_3d(seed_ref, x_ref, pe_ref, o_ref, *,
                       B, D, ts, tb, dropout_p, apply_dropout, use_hw_prng):
    """Regular path: x blocks (ts, tb, D), pe block (ts, 1, D) broadcasts."""
    y = x_ref[...] + pe_ref[...]

    if apply_dropout:
        i = pl.program_id(0)
        j = pl.program_id(1)
        shape = y.shape  # (ts, tb, D), static
        if use_hw_prng:
            pltpu.prng_seed(
                seed_ref[0]
                ^ (i * jnp.int32(_GOLDEN) + j * jnp.int32(40503) + jnp.int32(1)))
            bits = _to_i32_bits(pltpu.prng_random_bits(shape))
        else:
            base = (i * ts * B + j * tb) * D                  # scalar int32
            seed_mix = seed_ref[0] * jnp.int32(_GOLDEN)       # scalar int32
            s = lax.broadcasted_iota(jnp.int32, shape, 0)
            b = lax.broadcasted_iota(jnp.int32, shape, 1)
            d = lax.broadcasted_iota(jnp.int32, shape, 2)
            lin = base + s * jnp.int32(B * D) + b * jnp.int32(D) + d
            bits = _fmix32(lin ^ seed_mix)

        thr = jnp.int32(_keep_threshold_i32(dropout_p))
        inv_keep = jnp.asarray(1.0 / (1.0 - dropout_p), dtype=y.dtype)
        y = jnp.where(bits >= thr, y * inv_keep, jnp.zeros((), y.dtype))

    o_ref[...] = y.astype(o_ref.dtype)


# -----------------------------------------------------------------------------
# Tile selection
# -----------------------------------------------------------------------------
def _pick_ts_2d(S, BD, itemsize, target_bytes):
    row_bytes = max(1, BD * itemsize)
    ts = max(1, target_bytes // row_bytes)
    ts = min(ts, S)
    if S > 1:                              # keep >= 2 seq tiles (v7x megacore)
        ts = min(ts, -(-S // 2))
    if ts != S:                            # second-to-last block dim: mult of 8
        ts = max(8, (ts // 8) * 8)
        ts = min(ts, S)
    return ts


def _pick_tiles_3d(S, B, D, itemsize, target_bytes):
    align = max(8, 32 // max(1, itemsize))     # 8 f32 / 16 bf16 / 32 int8
    row_bytes = B * D * itemsize
    if row_bytes <= target_bytes:
        tb = B                                 # full batch: contiguous slabs
        ts = max(1, target_bytes // row_bytes)
        ts = min(ts, S)
        if S > 1:
            ts = min(ts, -(-S // 2))           # >= 2 seq tiles for megacore
    else:
        # Huge batch: dtype-aware sublane-aligned batch tiles.
        tb = max(align, (target_bytes // max(1, D * itemsize)) // align * align)
        tb = min(tb, B)
        ts = 1
    return ts, tb


# -----------------------------------------------------------------------------
# Wrapper
# -----------------------------------------------------------------------------
def positional_encoding_forward(x, pe, seed, *, dropout_p, training,
                                use_hw_prng=True, block_s=None, block_b=None,
                                target_block_bytes=2 * 1024 * 1024):
    """x: (S, B, D); pe: (max_len, 1, D) in x.dtype; seed: int32[1]."""
    S, B, D = x.shape
    max_len = pe.shape[0]
    assert S <= max_len, "seq_len exceeds the PE table's max_len"
    if pe.dtype != x.dtype:
        pe = pe.astype(x.dtype)  # slow path; build the table in x.dtype instead

    p = float(dropout_p)
    apply_dropout = bool(training) and p > 0.0
    if apply_dropout and p >= 1.0:
        return jnp.zeros_like(x)             # guard: 1/(1-p) would blow up

    itemsize = jnp.dtype(x.dtype).itemsize
    lane_dense = D < 128

    if lane_dense:
        BD = B * D
        x2 = x.reshape(S, BD)                 # contiguous view, free
        # TODO(synk): for very large B, broadcast PE in-kernel instead of
        # materializing (max_len, B*D) in HBM (doubles the PE read bytes).
        pe2 = jnp.broadcast_to(pe, (max_len, B, D)).reshape(max_len, BD)

        ts = _pick_ts_2d(S, BD, itemsize, target_block_bytes)
        if block_s is not None:
            ts = max(1, min(int(block_s), S))
            if ts != S:
                ts = min(max(8, (ts // 8) * 8), S)

        grid = (pl.cdiv(S, ts),)
        blk_bytes = ts * BD * itemsize
        vmem_limit = int(max(2 * 3 * blk_bytes + (2 << 20), 32 << 20))

        kernel = functools.partial(
            _pos_enc_kernel_2d, row_stride=BD, ts=ts, dropout_p=p,
            apply_dropout=apply_dropout, use_hw_prng=use_hw_prng)

        out2 = pl.pallas_call(
            kernel,
            out_shape=jax.ShapeDtypeStruct((S, BD), x.dtype),
            grid_spec=pltpu.PrefetchScalarGridSpec(
                num_scalar_prefetch=1,                    # seed lands in SMEM
                grid=grid,
                in_specs=[
                    pl.BlockSpec((ts, BD), lambda i, seed_ref: (i, 0)),
                    pl.BlockSpec((ts, BD), lambda i, seed_ref: (i, 0)),
                ],
                out_specs=pl.BlockSpec((ts, BD), lambda i, seed_ref: (i, 0)),
            ),
            compiler_params=pltpu.CompilerParams(
                dimension_semantics=("parallel",),
                vmem_limit_bytes=vmem_limit,
            ),
        )(seed, x2, pe2)
        return out2.reshape(S, B, D)

    # Regular 3-D path (D is lane-dense already).
    ts, tb = _pick_tiles_3d(S, B, D, itemsize, target_block_bytes)
    if block_s is not None:
        ts = max(1, min(int(block_s), S))
    if block_b is not None:
        tb = max(1, min(int(block_b), B))

    grid = (pl.cdiv(S, ts), pl.cdiv(B, tb))
    x_blk = ts * tb * D * itemsize
    pe_blk = ts * D * itemsize
    vmem_limit = int(max(2 * (2 * x_blk + pe_blk) + (2 << 20), 32 << 20))

    kernel = functools.partial(
        _pos_enc_kernel_3d, B=B, D=D, ts=ts, tb=tb, dropout_p=p,
        apply_dropout=apply_dropout, use_hw_prng=use_hw_prng)

    return pl.pallas_call(
        kernel,
        out_shape=jax.ShapeDtypeStruct((S, B, D), x.dtype),
        grid_spec=pltpu.PrefetchScalarGridSpec(
            num_scalar_prefetch=1,
            grid=grid,
            in_specs=[
                pl.BlockSpec((ts, tb, D), lambda i, j, seed_ref: (i, j, 0)),
                # PE block from the FULL table; constant along the batch axis.
                pl.BlockSpec((ts, 1, D), lambda i, j, seed_ref: (i, 0, 0)),
            ],
            out_specs=pl.BlockSpec((ts, tb, D), lambda i, j, seed_ref: (i, j, 0)),
        ),
        compiler_params=pltpu.CompilerParams(
            dimension_semantics=("parallel", "parallel"),
            vmem_limit_bytes=vmem_limit,
        ),
    )(seed, x, pe)


# -----------------------------------------------------------------------------
# Parameter setup (mirrors the torch __init__, deterministic)
# -----------------------------------------------------------------------------
def make_pe_table(max_len, d_model, dtype=jnp.float32):
    position = jnp.arange(max_len, dtype=jnp.float32)[:, None]
    div_term = jnp.exp(
        jnp.arange(0, d_model, 2, dtype=jnp.float32) * (-math.log(10000.0) / d_model))
    pe = jnp.zeros((max_len, 1, d_model), dtype=jnp.float32)
    pe = pe.at[:, 0, 0::2].set(jnp.sin(position * div_term))
    pe = pe.at[:, 0, 1::2].set(jnp.cos(position * div_term))
    return pe.astype(dtype)      # build directly in the model dtype


if __name__ == "__main__":
    dropout_p = 0.1
    seed = jnp.array([42], dtype=jnp.int32)
    key = jax.random.PRNGKey(0)
    k1, k2 = jax.random.split(key)

    def run_case(seq_len, batch, d_model, max_len, k):
        x = jax.random.normal(k, (seq_len, batch, d_model), dtype=jnp.float32)
        pe = make_pe_table(max_len, d_model, dtype=x.dtype)
        ref = x + pe[:seq_len]

        # eval mode: dropout is identity -> must equal x + pe[:S]
        out_eval = positional_encoding_forward(
            x, pe, seed, dropout_p=dropout_p, training=False)
        out_eval = jax.block_until_ready(out_eval)
        assert out_eval.shape == x.shape
        assert jnp.allclose(out_eval, ref, atol=1e-6, rtol=1e-6)

        # train mode: hardware PRNG by default, software hash as fallback
        try:
            out_train = positional_encoding_forward(
                x, pe, seed, dropout_p=dropout_p, training=True, use_hw_prng=True)
            out_train = jax.block_until_ready(out_train)
        except Exception:
            out_train = positional_encoding_forward(
                x, pe, seed, dropout_p=dropout_p, training=True, use_hw_prng=False)
            out_train = jax.block_until_ready(out_train)

        scaled = ref / (1.0 - dropout_p)
        is_zero = jnp.abs(out_train) < 1e-8
        is_kept = jnp.abs(out_train - scaled) < 1e-5
        assert bool(jnp.all(is_zero | is_kept))
        n_zero = int(jnp.sum(is_zero))
        assert 0 < n_zero < x.size
        return x, pe, ref

    # Lane-dense path (d_model < 128): kernel sees (S, B*D) blocks.
    x_small, pe_small, ref_small = run_case(16, 4, 32, 32, k1)
    # Regular 3-D path (d_model multiple of 128, full-batch contiguous tiles).
    run_case(16, 8, 128, 32, k2)

    # Explicitly exercise the software-hash dropout fallback path too.
    out_hash = positional_encoding_forward(
        x_small, pe_small, seed, dropout_p=dropout_p, training=True,
        use_hw_prng=False)
    out_hash = jax.block_until_ready(out_hash)
    scaled = ref_small / (1.0 - dropout_p)
    ok = (jnp.abs(out_hash) < 1e-8) | (jnp.abs(out_hash - scaled) < 1e-5)
    assert bool(jnp.all(ok))

    print("KERNEL_OK")
</pallas_src>

<mosaic_0001>
module attributes {stable_mosaic.version = 11 : i64} {
  func.func @_pos_enc_kernel_2d(%arg0: i32, %arg1: memref<1xi32, #tpu.memory_space<smem>>, %arg2: memref<8x128xf32, #tpu.memory_space<vmem>>, %arg3: memref<8x128xf32, #tpu.memory_space<vmem>>, %arg4: memref<8x128xf32, #tpu.memory_space<vmem>>) attributes {dimension_semantics = [#tpu.dimension_semantics<parallel>], iteration_bounds = array<i64: 2>, scalar_prefetch = 1 : i64, scratch_operands = 0 : i64, tpu.core_type = #tpu.core_type<tc>, window_params = [{transform_indices = @transform_0, window_bounds = array<i64: 8, 128>}, {transform_indices = @transform_1, window_bounds = array<i64: 8, 128>}, {transform_indices = @transform_2, window_bounds = array<i64: 8, 128>}]} {
    %c0 = arith.constant 0 : index
    %c0_0 = arith.constant 0 : index
    %0 = vector.load %arg2[%c0, %c0_0] : memref<8x128xf32, #tpu.memory_space<vmem>>, vector<8x128xf32>
    %c0_1 = arith.constant 0 : index
    %c0_2 = arith.constant 0 : index
    %1 = vector.load %arg3[%c0_1, %c0_2] : memref<8x128xf32, #tpu.memory_space<vmem>>, vector<8x128xf32>
    %2 = arith.addf %0, %1 : vector<8x128xf32>
    %c0_3 = arith.constant 0 : index
    %c0_4 = arith.constant 0 : index
    %3 = vector.load %arg4[%c0_3, %c0_4] : memref<8x128xf32, #tpu.memory_space<vmem>>, vector<8x128xf32>
    tpu.vector_store %arg4[%c0_3, %c0_4], %2 {strides = array<i32>} : memref<8x128xf32, #tpu.memory_space<vmem>>, vector<8x128xf32>,
    return
  }
  func.func @transform_0(%arg0: i32, %arg1: memref<1xi32, #tpu.memory_space<smem>>) -> (i32, i32) {
    %c0_i32 = arith.constant 0 : i32
    %c0_i32_0 = arith.constant 0 : i32
    return %arg0, %c0_i32 : i32, i32
  }
  func.func @transform_1(%arg0: i32, %arg1: memref<1xi32, #tpu.memory_space<smem>>) -> (i32, i32) {
    %c0_i32 = arith.constant 0 : i32
    %c0_i32_0 = arith.constant 0 : i32
    return %arg0, %c0_i32 : i32, i32
  }
  func.func @transform_2(%arg0: i32, %arg1: memref<1xi32, #tpu.memory_space<smem>>) -> (i32, i32) {
    %c0_i32 = arith.constant 0 : i32
    %c0_i32_0 = arith.constant 0 : i32
    return %arg0, %c0_i32 : i32, i32
  }
}

</mosaic_0001>

<bundles_post_ra>
// kernel: tpu_custom_call.1
= control target key start
LH: loop header
LB: loop body
LE: loop exit
PB: predicated region body
PF: predicated region fallthrough
CT: control target
= control target key end

     0   :  { %9 = vsyncpa [#allocation5], 0  ;;  %s693_s0 = inlined_call_operand.<no memory space> [shape: s32[1], index: 0, kind: input, shape index: {}]   ;;  %s694_s1 = inlined_call_operand.hbm [shape: f32[16,128], index: 1, kind: input, shape index: {}]   ;;  %s695_s2 = inlined_call_operand.hbm [shape: f32[32,128], index: 2, kind: input, shape index: {}]   ;;  %s696_s3 = inlined_call_operand.hbm [shape: f32[16,128], index: 3, kind: output, shape index: {}]  }
   0x1   :  { %11 = vsyncpa [#allocation5 + $0x1], 0 }
   0x2   :  { %12 = vsyncpa [#allocation8], 0 }
   0x3   :  { %14 = vsyncpa [#allocation8 + $0x1], 0 }
   0x4   :  { %15 = vsyncpa [#allocation6], 0 }
   0x5   :  { %17 = vsyncpa [#allocation6 + $0x1], 0  ;;  %s533_s12 = smov 0   ;;  %s535_s13 = smov 0  }
   0x6   :  { %s537_s0 = smov 0   ;;  %s539_s14 = smov 0  }
   0x7 LB: > { %s554_s15 = sadd.s32 4294967295, %s511_s14   ;;  %s315_s16 = sadd.s32 4294967294, %s511_s14   ;;  %s511_s14 = sphi %s539_s14, %s707_s14   ;;  %s507_s0 = sphi %s537_s0, %s706_s0   ;;  %s503_s13 = sphi %s535_s13, %s705_s13   ;;  %s499_s12 = sphi %s533_s12, %s704_s12  }
   0x8   : > { %s558_s17 = sadd.s32 1, %s511_s14   ;;  %s30_s18 = sadd.s32 1, %s507_s0 }
   0x9   : > { %s27_s19 = ssub.s32 %s511_s14, %s558_s17  ;;  %p37_p0 = scmp.ne.s32.totalorder %s507_s0, %s503_s13 }
   0xa   : > { %p28_p1 = scmp.eq.s32.totalorder %s27_s19, 0  ;;  %p38_p2 = scmp.eq.s32.totalorder %s511_s14, 0 }
   0xb   : > { %p43_p3 = scmp.ne.s32.totalorder %s503_s13, %s499_s12  ;;  %p44_p4 = scmp.eq.s32.totalorder %s554_s15, 0 }
   0xc   : > { %s570_s20 = scalar_select %p28_p1, %s507_s0, %s30_s18  }
   0xd   : > { %p572_p5 = por %p38_p2, %p37_p0  ;;  %p576_p6 = por %p44_p4, %p43_p3 }
   0xe   : > { %p93_p7 = scmp.eq.s32.totalorder %s554_s15, 1  ;;  %p99_p8 = scmp.eq.s32.totalorder %s315_s16, 1 }
   0xf   : > { %p347_p10 = scmp.lt.s32.totalorder %s511_s14, 2  ;;  %s592_s25 = sand.u32 1, %s507_s0  }
  0x10   : > { %p583_p11 = por %p93_p7, %p37_p0  ;;  %p587_p12 = por %p99_p8, %p43_p3 }
  0x11   : > { %s319_s26 = sshll.u32 %s511_s14, 3  ;;  %s318_s27 = sshll.u32 %s592_s25, 3 }
  0x12   : > { %s127_s30 = scalar_lea.hbm %s694_s1, %s319_s26  ;;  %s123_s5 = scalar_lea.vmem [#allocation4], %s318_s27 }
  0x13   : > { %s129_s4 = sshll.u32 %s127_s30, 4  ;;  %s131_s6 = sshll.u32 %s123_s5, 4  ;;  %s130_s4 = int_to_ptr.hbm [resolvable:$true] %s129_s4  ;;  %s132_s6 = int_to_ptr.vmem [resolvable:$true] %s131_s6 }
  0x14   : > { %p601_p13 = pnand %p347_p10, %p572_p5  ;;  %p322_p0 = scmp.ge.s32.totalorder %s511_s14, 1 }
  0x15   : > { %p155_p1 = scmp.lt.s32.totalorder %s511_s14, 3  ;;  %s120_s8 = scalar_lea.sflag [#allocation5], %s592_s25 }
  0x16   : > { %s381_s9 = sshra.s32 %s130_s4, 4  ;;  %p385_p3 = pneg %p601_p13  ;;  %s382_s9 = int_to_ptr.hbm [resolvable:$true] %s381_s9 }
  0x17   : > { %s383_s10 = scalar_lea.hbm %s382_s9, 8  ;;  %s388_s18 = scalar_lea.hbm %s694_s1, 16 }
  0x18   : > { %p384_p2 = scmp.ne.s32.totalorder %s382_s9, %s383_s10  ;;  %p389_p5 = scmp.lt.s32.totalorder %s382_s9, %s694_s1 }
  0x19   : > { %p390_p8 = scmp.lt.s32.totalorder %s388_s18, %s383_s10 }
  0x1a   : > { %p386_p4 = pnand %p385_p3, %p384_p2 }
  0x1b   : > { %p391_p10 = por %p390_p8, %p389_p5 }
  0x1c   : > { %p387_p7 = pneg %p386_p4 }
  0x1e   : > { %p392_p9 = pnand %p391_p10, %p387_p7 }
  0x20   : > { %395 = shalt.err (!%p392_p9)
}
  0x21   : > { %339 = dma.hbm_to_vmem [thread:$0]  (!%p601_p13), %s130_s4, 128, %s132_s6, %s120_s8  }
  0x22   : > { %p625_p2 = pnand %p322_p0, %p155_p1  ;;  %s146_s5 = scalar_lea.hbm %s695_s2, %s319_s26 }
  0x23   : > { %s148_s9 = sshll.u32 %s146_s5, 4  ;;  %s142_s10 = scalar_lea.vmem [#allocation7], %s318_s27  ;;  %s149_s9 = int_to_ptr.hbm [resolvable:$true] %s148_s9 }
  0x24   : > { %s150_s11 = sshll.u32 %s142_s10, 4  ;;  %s139_s16 = scalar_lea.sflag [#allocation8], %s592_s25  ;;  %s151_s11 = int_to_ptr.vmem [resolvable:$true] %s150_s11 }
  0x25   : > { %s411_s18 = sshra.s32 %s149_s9, 4  ;;  %s418_s8 = scalar_lea.hbm %s695_s2, 32  ;;  %s412_s18 = int_to_ptr.hbm [resolvable:$true] %s411_s18 }
  0x26   : > { %s413_s19 = scalar_lea.hbm %s412_s18, 8  ;;  %p419_p4 = scmp.lt.s32.totalorder %s412_s18, %s695_s2 }
  0x27   : > { %p414_p9 = scmp.ne.s32.totalorder %s412_s18, %s413_s19  ;;  %p420_p7 = scmp.lt.s32.totalorder %s418_s8, %s413_s19 }
  0x29   : > { %p416_p0 = pnand %p414_p9, %p385_p3  ;;  %p421_p5 = por %p420_p7, %p419_p4 }
  0x2b   : > { %p417_p1 = pneg %p416_p0 }
  0x2d   : > { %p422_p8 = pnand %p421_p5, %p417_p1 }
  0x2f   : > { %425 = shalt.err (!%p422_p8)
}
  0x30   : > { %342 = dma.hbm_to_vmem [thread:$0]  (!%p601_p13), %s149_s9, 128, %s151_s11, %s139_s16  }
  0x31   : > { %159 = sbr.rel (%p625_p2) target bundleno = 72 (0x48), region = 28  ;;  %s647_s25 = sand.u32 (!%p625_p2), 1, %s503_s13  }
  0x32   : > { %s323_s27 = sshll.u32 (!%p625_p2), %s647_s25, 3  ;;  %s162_s29 = scalar_lea.sflag (!%p625_p2), [#allocation5], %s647_s25 }
  0x33   : > { %s165_s30 = scalar_lea.vmem (!%p625_p2), [#allocation4], %s323_s27 }
  0x36   : > { %486 = dma.done.wait (%p576_p6), %s162_s29, 128  }
  0x37   : > { %488 = vsyncadd (%p576_p6), %s162_s29, 4294967168  ;;  %s172_s7 = scalar_lea.sflag [#allocation8], %s647_s25  ;;  %s175_s5 = scalar_lea.vmem [#allocation7], %s323_s27 }
  0x38   : > { %490 = dma.done.wait (%p576_p6), %s172_s7, 128  }
  0x39   : > { %492 = vsyncadd (%p576_p6), %s172_s7, 4294967168  ;;  %s327_s28 = sshll.u32 %s554_s15, 3  ;;  %s201_s16 = scalar_lea.vmem [#allocation9], %s323_s27  ;;  %v202_v0 = vld [vmem:[%s165_s30] sm:$0xff]  ;;  %v203_v1 = vld [vmem:[%s175_s5] sm:$0xff] }
  0x3a   : > { %s217_s11 = scalar_lea.hbm %s696_s3, %s327_s28  ;;  %s219_s18 = sshll.u32 %s201_s16, 4  ;;  %v204_v2 = vadd.f32 %v203_v1, %v202_v0  ;;  %s220_s18 = int_to_ptr.vmem [resolvable:$true] %s219_s18 }
  0x3b   : > { %s221_s19 = sshll.u32 %s217_s11, 4  ;;  %s207_s4 = scalar_lea.sflag [#allocation6], %s647_s25  ;;  %s222_s19 = int_to_ptr.hbm [resolvable:$true] %s221_s19 }
  0x3c   : > { %205 = vst [vmem:[%s201_s16] sm:$0xff] %v204_v2  ;;  %s455_s22 = sshra.s32 %s222_s19, 4  ;;  %s461_s21 = scalar_lea.hbm %s696_s3, 16  ;;  %s456_s22 = int_to_ptr.hbm [resolvable:$true] %s455_s22 }
  0x3d   : > { %s457_s6 = scalar_lea.hbm %s456_s22, 8  ;;  %p462_p10 = scmp.lt.s32.totalorder %s456_s22, %s696_s3 }
  0x3e   : > { %p458_p6 = scmp.ne.s32.totalorder %s456_s22, %s457_s6  ;;  %p463_p2 = scmp.lt.s32.totalorder %s461_s21, %s457_s6 }
  0x40   : > { %p459_p13 = pnand %p458_p6, %p583_p11  ;;  %p464_p9 = por %p463_p2, %p462_p10 }
  0x42   : > { %p460_p3 = pneg %p459_p13 }
  0x44   : > { %p465_p0 = pnand %p464_p9, %p460_p3 }
  0x46   : > { %468 = shalt.err (!%p465_p0)
}
  0x47   : > { %334 = dma.vmem_to_hbm [thread:$0]  (%p583_p11), %s220_s18, 128, %s222_s19, %s207_s4  }
  0x48 PF: > { %s233_s25 = sand.u32 1, %s499_s12   ;;  %p703_p1 = scmp.ge.s32.totalorder %s511_s14, 2 }
  0x49   : > { %s234_s29 = scalar_lea.sflag [#allocation6], %s233_s25 }
  0x4a   : > { %p344_p4 = pnand %p703_p1, %p587_p12 }
  0x4c   : > { %p345_p7 = pneg %p344_p4 }
  0x4e   : > { %494 = dma.done.wait (%p345_p7), %s234_s29, 128  }
  0x4f   : > { %496 = vsyncadd (%p345_p7), %s234_s29, 4294967168  ;;  %p20_p5 = scmp.ge.s32.totalorder %s558_s17, 4   ;;  %s704_s12 = smov %s503_s13 }
  0x50   : > { %s705_s13 = smov %s507_s0  ;;  %s706_s0 = smov %s570_s20 }
  0x51   : > { %s707_s14 = smov %s558_s17  ;;  %22 = sbr.rel (!%p20_p5) target bundleno = 7 (0x7), region = 86 }
  0x56   :  { %240 = vsyncpa [#allocation5], 1 }
  0x57   :  { %242 = vsyncpa [#allocation5 + $0x1], 1 }
  0x58   :  { %243 = vsyncpa [#allocation8], 1 }
  0x59   :  { %245 = vsyncpa [#allocation8 + $0x1], 1 }
  0x5a   :  { %246 = vsyncpa [#allocation6], 1 }
  0x5b   :  { %248 = vsyncpa [#allocation6 + $0x1], 1 }

</bundles_post_ra>
